<compile_context>
chip_gen: v6e
topology: v6e:2x2x1
jax: 0.10.0
libtpu: 0.0.40
codegen_flags: <defaults>
</compile_context>

<pallas_src>
import functools

import jax
import jax.numpy as jnp
from jax.experimental import pallas as pl
from jax.experimental.pallas import tpu as pltpu


def _round_up(n, m):
    return -(-n // m) * m


def _auto_block_b(B, F, vmem_budget_bytes=16 * 1024 * 1024, cap=2048):
    """Largest lane-aligned batch tile under a conservative VMEM budget."""
    # Double-buffered (F, block_b) f32 x tile + (1, block_b) f32 out tile;
    # weights/biases are negligible.
    bytes_per_row = 2 * 4 * (F + 1)
    vmem_rows = max(128, (vmem_budget_bytes // bytes_per_row) // 128 * 128)
    b128 = _round_up(B, 128)
    # Keep >= 2 grid steps when possible so v7x's two TensorCores both get work.
    two_core = max(128, _round_up(b128 // 2, 128)) if b128 >= 256 else b128
    return max(128, min(cap, b128, vmem_rows, two_core))


def _mlp_kernel(x_ref, w1_ref, b1_ref, w2_ref, b2_ref, w3_ref, b3_ref,
                w4_ref, b4_ref, o_ref):
    # x tile: (F, block_b)  -- batch on lanes.
    x = x_ref[...].astype(jnp.float32)

    # fc1 + relu  (dropout1 = identity in eval mode)
    h = jnp.dot(w1_ref[...], x, preferred_element_type=jnp.float32)
    h = jnp.maximum(h + b1_ref[...], 0.0)            # (20, block_b)
    # fc2 + relu  (dropout2 = identity)
    h = jnp.dot(w2_ref[...], h, preferred_element_type=jnp.float32)
    h = jnp.maximum(h + b2_ref[...], 0.0)            # (7, block_b)
    # fc3 + relu  (dropout3 = identity)
    h = jnp.dot(w3_ref[...], h, preferred_element_type=jnp.float32)
    h = jnp.maximum(h + b3_ref[...], 0.0)            # (3, block_b)
    # fc4 + sigmoid (exp on EUP, approx reciprocal on EUP -> VALU stays free)
    z = jnp.dot(w4_ref[...], h, preferred_element_type=jnp.float32) + b4_ref[...]
    o_ref[...] = pl.reciprocal(1.0 + jnp.exp(-z), approx=True).astype(o_ref.dtype)


@functools.partial(jax.jit, static_argnames=("block_b",))
def rec_model_forward(x, params, block_b=None):
    """x: (B, feature_size); params: weights (out, in), biases (out, 1).

    Returns (B, 1) float32, matching the PyTorch module's output shape.
    """
    B, F = x.shape
    if block_b is None:
        block_b = _auto_block_b(B, F)

    w1, b1 = params["w1"], params["b1"]  # (20, F), (20, 1)
    w2, b2 = params["w2"], params["b2"]  # (7, 20), (7, 1)
    w3, b3 = params["w3"], params["b3"]  # (3, 7),  (3, 1)
    w4, b4 = params["w4"], params["b4"]  # (1, 3),  (1, 1)

    # Feature-major layout: batch on the lane (last) axis, padded to block_b.
    B_pad = _round_up(B, block_b)
    x_t = x.T                                   # (F, B)
    if B_pad != B:
        x_t = jnp.pad(x_t, ((0, 0), (0, B_pad - B)))

    grid = (B_pad // block_b,)
    full = lambda a: pl.BlockSpec(a.shape, lambda i: (0, 0))

    out_t = pl.pallas_call(
        _mlp_kernel,
        out_shape=jax.ShapeDtypeStruct((1, B_pad), jnp.float32),
        grid_spec=pltpu.PrefetchScalarGridSpec(
            num_scalar_prefetch=0,
            grid=grid,
            in_specs=[
                pl.BlockSpec((F, block_b), lambda i: (0, i)),  # x tile over batch
                full(w1), full(b1),
                full(w2), full(b2),
                full(w3), full(b3),
                full(w4), full(b4),
            ],
            # lane-dense output slab: (1, block_b) -> unmasked full-lane stores
            out_specs=pl.BlockSpec((1, block_b), lambda i: (0, i)),
        ),
        compiler_params=pltpu.CompilerParams(
            dimension_semantics=("parallel",)),
    )(x_t, w1, b1, w2, b2, w3, b3, w4, b4)

    # Slice off the batch padding and return (B, 1) like the PyTorch module.
    return out_t[:, :B].T


def init_params(key, feature_size):
    """Deterministic init mimicking nn.Linear (uniform +-1/sqrt(fan_in)).

    Weights stored (out, in); biases stored (out, 1) so they broadcast over
    the lane (batch) axis inside the kernel.
    """
    dims = [(feature_size, 20), (20, 7), (7, 3), (3, 1)]
    params = {}
    for idx, (fan_in, fan_out) in enumerate(dims, start=1):
        key, kw, kb = jax.random.split(key, 3)
        bound = 1.0 / float(fan_in) ** 0.5
        params[f"w{idx}"] = jax.random.uniform(
            kw, (fan_out, fan_in), jnp.float32, minval=-bound, maxval=bound)
        params[f"b{idx}"] = jax.random.uniform(
            kb, (fan_out, 1), jnp.float32, minval=-bound, maxval=bound)
    return params


def _reference_forward(x, params):
    h = jnp.maximum(x @ params["w1"].T + params["b1"].T, 0.0)
    h = jnp.maximum(h @ params["w2"].T + params["b2"].T, 0.0)
    h = jnp.maximum(h @ params["w3"].T + params["b3"].T, 0.0)
    return jax.nn.sigmoid(h @ params["w4"].T + params["b4"].T)


if __name__ == "__main__":
    key = jax.random.PRNGKey(0)
    batch, feature_size = 8, 32

    kx, kp = jax.random.split(key)
    x = jax.random.normal(kx, (batch, feature_size), jnp.float32)
    params = init_params(kp, feature_size)

    out = rec_model_forward(x, params)
    out = jax.block_until_ready(out)

    ref = _reference_forward(x, params)
    assert out.shape == (batch, 1), out.shape
    # approx reciprocal in the sigmoid -> slightly looser tolerance
    assert jnp.allclose(out, ref, atol=2e-3, rtol=2e-3), (
        f"max abs diff {jnp.max(jnp.abs(out - ref))}")
    print("KERNEL_OK")
</pallas_src>

<mosaic_0001>
module attributes {stable_mosaic.version = 11 : i64} {
  func.func @_mlp_kernel(%arg0: i32, %arg1: memref<32x128xf32, #tpu.memory_space<vmem>>, %arg2: memref<20x32xf32, #tpu.memory_space<vmem>>, %arg3: memref<20x1xf32, #tpu.memory_space<vmem>>, %arg4: memref<7x20xf32, #tpu.memory_space<vmem>>, %arg5: memref<7x1xf32, #tpu.memory_space<vmem>>, %arg6: memref<3x7xf32, #tpu.memory_space<vmem>>, %arg7: memref<3x1xf32, #tpu.memory_space<vmem>>, %arg8: memref<1x3xf32, #tpu.memory_space<vmem>>, %arg9: memref<1x1xf32, #tpu.memory_space<vmem>>, %arg10: memref<1x128xf32, #tpu.memory_space<vmem>>) attributes {dimension_semantics = [#tpu.dimension_semantics<parallel>], iteration_bounds = array<i64: 1>, scalar_prefetch = 0 : i64, scratch_operands = 0 : i64, tpu.core_type = #tpu.core_type<tc>, window_params = [{transform_indices = @transform_0, window_bounds = array<i64: 32, 128>}, {pipeline_mode = #tpu.pipeline_mode<synchronous>, transform_indices = @transform_1, window_bounds = array<i64: 20, 32>}, {pipeline_mode = #tpu.pipeline_mode<synchronous>, transform_indices = @transform_2, window_bounds = array<i64: 20, 1>}, {pipeline_mode = #tpu.pipeline_mode<synchronous>, transform_indices = @transform_3, window_bounds = array<i64: 7, 20>}, {pipeline_mode = #tpu.pipeline_mode<synchronous>, transform_indices = @transform_4, window_bounds = array<i64: 7, 1>}, {pipeline_mode = #tpu.pipeline_mode<synchronous>, transform_indices = @transform_5, window_bounds = array<i64: 3, 7>}, {pipeline_mode = #tpu.pipeline_mode<synchronous>, transform_indices = @transform_6, window_bounds = array<i64: 3, 1>}, {pipeline_mode = #tpu.pipeline_mode<synchronous>, transform_indices = @transform_7, window_bounds = array<i64: 1, 3>}, {pipeline_mode = #tpu.pipeline_mode<synchronous>, transform_indices = @transform_8, window_bounds = array<i64: 1, 1>}, {transform_indices = @transform_9, window_bounds = array<i64: 1, 128>}]} {
    %c0 = arith.constant 0 : index
    %c0_0 = arith.constant 0 : index
    %0 = vector.load %arg1[%c0, %c0_0] : memref<32x128xf32, #tpu.memory_space<vmem>>, vector<32x128xf32>
    %c0_1 = arith.constant 0 : index
    %c0_2 = arith.constant 0 : index
    %1 = vector.load %arg2[%c0_1, %c0_2] : memref<20x32xf32, #tpu.memory_space<vmem>>, vector<20x32xf32>
    %cst = arith.constant dense<0.000000e+00> : vector<20x128xf32>
    %2 = tpu.matmul %1, %0, %cst {dimension_numbers = #tpu.dot_dimension_numbers<[1], [0], [0], [1], [0, 0, 1, 1], [], []>} : vector<20x32xf32>, vector<32x128xf32>, vector<20x128xf32> -> vector<20x128xf32>
    %c0_3 = arith.constant 0 : index
    %c0_4 = arith.constant 0 : index
    %3 = vector.load %arg3[%c0_3, %c0_4] : memref<20x1xf32, #tpu.memory_space<vmem>>, vector<20x1xf32>
    %4 = vector.broadcast %3 : vector<20x1xf32> to vector<20x128xf32>
    %5 = arith.addf %2, %4 : vector<20x128xf32>
    %cst_5 = arith.constant 0.000000e+00 : f32
    %6 = vector.broadcast %cst_5 : f32 to vector<20x128xf32>
    %7 = arith.maximumf %5, %6 : vector<20x128xf32>
    %c0_6 = arith.constant 0 : index
    %c0_7 = arith.constant 0 : index
    %8 = vector.load %arg4[%c0_6, %c0_7] : memref<7x20xf32, #tpu.memory_space<vmem>>, vector<7x20xf32>
    %cst_8 = arith.constant dense<0.000000e+00> : vector<7x128xf32>
    %9 = tpu.matmul %8, %7, %cst_8 {dimension_numbers = #tpu.dot_dimension_numbers<[1], [0], [0], [1], [0, 0, 1, 1], [], []>} : vector<7x20xf32>, vector<20x128xf32>, vector<7x128xf32> -> vector<7x128xf32>
    %c0_9 = arith.constant 0 : index
    %c0_10 = arith.constant 0 : index
    %10 = vector.load %arg5[%c0_9, %c0_10] : memref<7x1xf32, #tpu.memory_space<vmem>>, vector<7x1xf32>
    %11 = vector.broadcast %10 : vector<7x1xf32> to vector<7x128xf32>
    %12 = arith.addf %9, %11 : vector<7x128xf32>
    %cst_11 = arith.constant 0.000000e+00 : f32
    %13 = vector.broadcast %cst_11 : f32 to vector<7x128xf32>
    %14 = arith.maximumf %12, %13 : vector<7x128xf32>
    %c0_12 = arith.constant 0 : index
    %c0_13 = arith.constant 0 : index
    %15 = vector.load %arg6[%c0_12, %c0_13] : memref<3x7xf32, #tpu.memory_space<vmem>>, vector<3x7xf32>
    %cst_14 = arith.constant dense<0.000000e+00> : vector<3x128xf32>
    %16 = tpu.matmul %15, %14, %cst_14 {dimension_numbers = #tpu.dot_dimension_numbers<[1], [0], [0], [1], [0, 0, 1, 1], [], []>} : vector<3x7xf32>, vector<7x128xf32>, vector<3x128xf32> -> vector<3x128xf32>
    %c0_15 = arith.constant 0 : index
    %c0_16 = arith.constant 0 : index
    %17 = vector.load %arg7[%c0_15, %c0_16] : memref<3x1xf32, #tpu.memory_space<vmem>>, vector<3x1xf32>
    %18 = vector.broadcast %17 : vector<3x1xf32> to vector<3x128xf32>
    %19 = arith.addf %16, %18 : vector<3x128xf32>
    %cst_17 = arith.constant 0.000000e+00 : f32
    %20 = vector.broadcast %cst_17 : f32 to vector<3x128xf32>
    %21 = arith.maximumf %19, %20 : vector<3x128xf32>
    %c0_18 = arith.constant 0 : index
    %c0_19 = arith.constant 0 : index
    %22 = vector.load %arg8[%c0_18, %c0_19] : memref<1x3xf32, #tpu.memory_space<vmem>>, vector<1x3xf32>
    %cst_20 = arith.constant dense<0.000000e+00> : vector<1x128xf32>
    %23 = tpu.matmul %22, %21, %cst_20 {dimension_numbers = #tpu.dot_dimension_numbers<[1], [0], [0], [1], [0, 0, 1, 1], [], []>} : vector<1x3xf32>, vector<3x128xf32>, vector<1x128xf32> -> vector<1x128xf32>
    %c0_21 = arith.constant 0 : index
    %c0_22 = arith.constant 0 : index
    %24 = vector.load %arg9[%c0_21, %c0_22] : memref<1x1xf32, #tpu.memory_space<vmem>>, vector<1x1xf32>
    %25 = vector.broadcast %24 : vector<1x1xf32> to vector<1x128xf32>
    %26 = arith.addf %23, %25 : vector<1x128xf32>
    %cst_23 = arith.constant 0.000000e+00 : f32
    %27 = vector.broadcast %cst_23 : f32 to vector<1x128xf32>
    %28 = arith.subf %27, %26 : vector<1x128xf32>
    %29 = math.exp %28 : vector<1x128xf32>
    %cst_24 = arith.constant 1.000000e+00 : f32
    %30 = vector.broadcast %cst_24 : f32 to vector<1x128xf32>
    %31 = arith.addf %30, %29 : vector<1x128xf32>
    %32 = tpu.reciprocal %31 {approx = true} : vector<1x128xf32> -> vector<1x128xf32>
    %c0_25 = arith.constant 0 : index
    %c0_26 = arith.constant 0 : index
    %33 = vector.load %arg10[%c0_25, %c0_26] : memref<1x128xf32, #tpu.memory_space<vmem>>, vector<1x128xf32>
    tpu.vector_store %arg10[%c0_25, %c0_26], %32 {strides = array<i32>} : memref<1x128xf32, #tpu.memory_space<vmem>>, vector<1x128xf32>,
    return
  }
  func.func @transform_0(%arg0: i32) -> (i32, i32) {
    %c0_i32 = arith.constant 0 : i32
    %c0_i32_0 = arith.constant 0 : i32
    return %c0_i32, %arg0 : i32, i32
  }
  func.func @transform_1(%arg0: i32) -> (i32, i32) {
    %c0_i32 = arith.constant 0 : i32
    %c0_i32_0 = arith.constant 0 : i32
    %c0_i32_1 = arith.constant 0 : i32
    return %c0_i32, %c0_i32_0 : i32, i32
  }
  func.func @transform_2(%arg0: i32) -> (i32, i32) {
    %c0_i32 = arith.constant 0 : i32
    %c0_i32_0 = arith.constant 0 : i32
    %c0_i32_1 = arith.constant 0 : i32
    return %c0_i32, %c0_i32_0 : i32, i32
  }
  func.func @transform_3(%arg0: i32) -> (i32, i32) {
    %c0_i32 = arith.constant 0 : i32
    %c0_i32_0 = arith.constant 0 : i32
    %c0_i32_1 = arith.constant 0 : i32
    return %c0_i32, %c0_i32_0 : i32, i32
  }
  func.func @transform_4(%arg0: i32) -> (i32, i32) {
    %c0_i32 = arith.constant 0 : i32
    %c0_i32_0 = arith.constant 0 : i32
    %c0_i32_1 = arith.constant 0 : i32
    return %c0_i32, %c0_i32_0 : i32, i32
  }
  func.func @transform_5(%arg0: i32) -> (i32, i32) {
    %c0_i32 = arith.constant 0 : i32
    %c0_i32_0 = arith.constant 0 : i32
    %c0_i32_1 = arith.constant 0 : i32
    return %c0_i32, %c0_i32_0 : i32, i32
  }
  func.func @transform_6(%arg0: i32) -> (i32, i32) {
    %c0_i32 = arith.constant 0 : i32
    %c0_i32_0 = arith.constant 0 : i32
    %c0_i32_1 = arith.constant 0 : i32
    return %c0_i32, %c0_i32_0 : i32, i32
  }
  func.func @transform_7(%arg0: i32) -> (i32, i32) {
    %c0_i32 = arith.constant 0 : i32
    %c0_i32_0 = arith.constant 0 : i32
    %c0_i32_1 = arith.constant 0 : i32
    return %c0_i32, %c0_i32_0 : i32, i32
  }
  func.func @transform_8(%arg0: i32) -> (i32, i32) {
    %c0_i32 = arith.constant 0 : i32
    %c0_i32_0 = arith.constant 0 : i32
    %c0_i32_1 = arith.constant 0 : i32
    return %c0_i32, %c0_i32_0 : i32, i32
  }
  func.func @transform_9(%arg0: i32) -> (i32, i32) {
    %c0_i32 = arith.constant 0 : i32
    %c0_i32_0 = arith.constant 0 : i32
    return %c0_i32, %arg0 : i32, i32
  }
}

</mosaic_0001>

<bundles_post_ra>
// kernel: rec_model_forward.1
= control target key start
LH: loop header
LB: loop body
LE: loop exit
PB: predicated region body
PF: predicated region fallthrough
CT: control target
= control target key end

     0   :  { %v492_v0 = vmov 0.0   ;;  %vm493_vm0 = vmmov 0   ;;  %v494_v4 = vmov 0   ;;  %vm59_vm1 = vcmask 261120   ;;  %s620_s0 = inlined_call_operand.vmem [shape: f32[32,128], index: 0, kind: input, shape index: {}]   ;;  %s621_s2 = inlined_call_operand.vmem [shape: f32[20,1], index: 2, kind: input, shape index: {}]   ;;  %s622_s8 = inlined_call_operand.<no memory space> [shape: f32[1,1], index: 8, kind: input, shape index: {}]   ;;  %s623_s1 = inlined_call_operand.vmem [shape: f32[20,32], index: 1, kind: input, shape index: {}]   ;;  %s624_s4 = inlined_call_operand.vmem [shape: f32[7,1], index: 4, kind: input, shape index: {}]   ;;  %s625_s6 = inlined_call_operand.vmem [shape: f32[3,1], index: 6, kind: input, shape index: {}]   ;;  %s626_s3 = inlined_call_operand.vmem [shape: f32[7,20], index: 3, kind: input, shape index: {}]   ;;  %s627_s5 = inlined_call_operand.vmem [shape: f32[3,7], index: 5, kind: input, shape index: {}]   ;;  %s628_s7 = inlined_call_operand.vmem [shape: f32[1,3], index: 7, kind: input, shape index: {}]   ;;  %s629_s9 = inlined_call_operand.vmem [shape: f32[1,128], index: 9, kind: output, shape index: {}]  }
   0x1   :  { %447 = vmatprep.subr.mxu0 %v492_v0  ;;  %v37_v1 = vld [vmem:[%s620_s0 + $0x18] sm:$0xff]  ;;  %v36_v2 = vld [vmem:[%s620_s0 + $0x10] sm:$0xff]  ;;  %455 = vmatprep.mubr.msk.f32.mxu0 %vm493_vm0, %v492_v0  ;;  %v14_v3 = vstv %s622_s8  ;;  %v35_v5 = vld [vmem:[%s620_s0 + $0x8] sm:$0xff]  ;;  %vm163_vm2 = vcmask 1043456   ;;  %vm159_vm3 = vcmask 162816   ;;  %vm249_vm4 = vcmask 1046528  }
   0x2   :  { %448 = vmatpush3.msra.mxu0 %v37_v1  ;;  %486 = vset.pattern.permute.xlu0 %v494_v4  ;;  %15 = vst [vmem:[#allocation2] sm:$0x1] %v14_v3  ;;  %v43_v6 = vld [vmem:[%s621_s2 + $0x10] sm:$0xf]  ;;  %v41_v7 = vld [vmem:[%s621_s2] sm:$0xff]  ;;  %v42_v9 = vld [vmem:[%s621_s2 + $0x8] sm:$0xff]  ;;  %v331_v44 = vlaneseq }
   0x3   :  { %449 = vmatprep.subr.mxu0 %v492_v0  ;;  %487 = vset.pattern.permute.xlu1 %v494_v4  ;;  %v34_v8 = vld [vmem:[%s620_s0] sm:$0xff]  ;;  %v39_v13 = vld [vmem:[%s623_s1 + $0x8] sm:$0xff]  ;;  %v40_v15 = vld [vmem:[%s623_s1 + $0x10] sm:$0xf]  ;;  %vm245_vm5 = vcmask 56320   ;;  %vm339_vm6 = vcmask 1042432  }
   0x4   :  { %450 = vmatpush3.msra.mxu0 %v36_v2  ;;  %56 = vperm.xlu0 %486, %v43_v6   ;;  %v38_v10 = vld [vmem:[%s623_s1] sm:$0xff]  ;;  %vm335_vm7 = vcmask 23552   ;;  %v332_v45 = vshrl.u32 %v331_v44, 7 }
   0x5   :  { %451 = vmatprep.subr.mxu0 %v492_v0  ;;  %46 = vperm.xlu1 %487, %v41_v7   ;;  %v153_v11 = vld [vmem:[%s624_s4] sm:$0x7f] }
   0x6   :  { %452 = vmatpush3.msra.mxu0 %v35_v5  ;;  %464 = vmatprep.subr.mxu1 %v492_v0  ;;  %v239_v12 = vld [vmem:[%s625_s6] sm:$0x7]  ;;  %v333_v46 = vsub.s32 0, %v332_v45 }
   0x7   :  { %453 = vmatprep.subr.mxu0 %v492_v0  ;;  %470 = vmatprep.mubr.msk.f32.mxu1 %vm493_vm0, %v492_v0  ;;  %v152_v31 = vld [vmem:[%s626_s3] sm:$0x7f] }
   0x8   :  { %454 = vmatpush3.msra.mxu0 %v34_v8  ;;  %51 = vperm.xlu0 %486, %v42_v9   ;;  %v238_v37 = vld [vmem:[%s627_s5] sm:$0x7] }
   0x9   :  { %456 = vmatmul.mubr.msk.f32.vlgmr.msra.gmra.mxu0 %vm59_vm1, %v38_v10  ;;  %156 = vperm.xlu1 %487, %v153_v11   ;;  %v325_v14 = vld [vmem:[#allocation2] sm:$0x1] }
   0xa   :  { %458 = vmatprep.mubr.msk.f32.mxu0 %vm493_vm0, %v492_v0  ;;  %v324_v43 = vld [vmem:[%s628_s7] sm:$0x1] }
   0xc   :  { %242 = vperm.xlu0 %486, %v239_v12  }
   0xd   :  { %459 = vmatmul.mubr.msk.f32.gmra.mxu0 %vm59_vm1, %v39_v13  ;;  %328 = vperm.xlu1 %487, %v325_v14  }
   0xe   :  { %461 = vmatprep.mubr.msk.f32.mxu0 %vm493_vm0, %v492_v0 }
  0x11   :  { %462 = vmatmul.mubr.msk.f32.gmra.mxu0 %vm59_vm1, %v40_v15 }
  0x7f   :  { %v57_v17 = vpop.permute.xlu0 %56 }
  0x80   :  { %v47_v21 = vpop.permute.xlu1 %46 }
  0x83   :  { %v52_v22 = vpop.permute.xlu0 %51 }
  0x84   :  { %v157_v32 = vpop.permute.xlu1 %156 }
  0x87   :  { %v243_v38 = vpop.permute.xlu0 %242 }
  0x88   :  { %v329_v47 = vpop.permute.xlu1 %328 }
  0x89   :  { %v334_v48 = vrot.slane %v329_v47, %v333_v46 }
  0xc9   :  { %v135_v16 = vpop.f32.mrf.mxu0 }
  0xca   :  { %v136_v27 = vadd.f32 %v135_v16, %v47_v21 }
  0xcb   :  { %v457_v18 = vpop.f32.mrf.mxu0 }
  0xcc   :  { %v149_v30 = vmax.f32 %v136_v27, 0.0 }
  0xcd   :  { %v140_v19 = vpop.f32.mrf.mxu0 }
  0xce   :  { %v141_v24 = vadd.f32 %v140_v19, %v52_v22 }
  0xcf   :  { %v460_v20 = vpop.f32.mrf.mxu0 }
  0xd0   :  { %v150_v29 = vmax.f32 %v141_v24, 0.0 }
  0xd1   :  { %v145_v23 = vpop.f32.mrf.mxu0 }
  0xd2   :  { %v146_v25 = vadd.f32 %v145_v23, %v57_v17 }
  0xd3   :  { %v463_v26 = vpop.f32.mrf.mxu0 }
  0xd4   :  { %v151_v28 = vmax.f32 %v146_v25, 0.0 }
  0xd6   :  { %465 = vmatpush3.msk.msra.mxu1 %vm163_vm2, %v151_v28 }
  0xd7   :  { %466 = vmatprep.subr.mxu1 %v492_v0 }
  0xd8   :  { %467 = vmatpush3.msra.mxu1 %v150_v29 }
  0xd9   :  { %468 = vmatprep.subr.mxu1 %v492_v0 }
  0xda   :  { %469 = vmatpush3.msra.mxu1 %v149_v30 }
  0xdb   :  { %471 = vmatmul.mubr.msk.f32.vlgmr.msra.gmra.mxu1 %vm159_vm3, %v152_v31  ;;  %473 = vmatprep.subr.mxu1 %v492_v0 }
  0xdc   :  { %475 = vmatprep.mubr.msk.f32.mxu1 %vm493_vm0, %v492_v0 }
 0x19b   :  { %v233_v33 = vpop.f32.mrf.mxu1 }
 0x19c   :  { %v234_v34 = vadd.f32 %v233_v33, %v157_v32 }
 0x19d   :  { %v472_v35 = vpop.f32.mrf.mxu1 }
 0x19e   :  { %v237_v36 = vmax.f32 %v234_v34, 0.0 }
 0x1a0   :  { %474 = vmatpush3.msk.msra.mxu1 %vm249_vm4, %v237_v36 }
 0x1a1   :  { %476 = vmatmul.mubr.msk.f32.vlgmr.msra.gmra.mxu1 %vm245_vm5, %v238_v37  ;;  %478 = vmatprep.subr.mxu1 %v492_v0 }
 0x1a2   :  { %480 = vmatprep.mubr.msk.f32.mxu1 %vm493_vm0, %v492_v0 }
 0x261   :  { %v319_v39 = vpop.f32.mrf.mxu1 }
 0x262   :  { %v320_v40 = vadd.f32 %v319_v39, %v243_v38 }
 0x263   :  { %v477_v41 = vpop.f32.mrf.mxu1 }
 0x264   :  { %v323_v42 = vmax.f32 %v320_v40, 0.0 }
 0x266   :  { %479 = vmatpush3.msk.msra.mxu1 %vm339_vm6, %v323_v42 }
 0x267   :  { %481 = vmatmul.mubr.msk.f32.vlgmr.msra.gmra.mxu1 %vm335_vm7, %v324_v43 }
 0x327   :  { %v409_v49 = vpop.f32.mrf.mxu1 }
 0x328   :  { %v410_v50 = vadd.f32 %v409_v49, %v334_v48 }
 0x329   :  { %v482_v51 = vpop.f32.mrf.mxu1 }
 0x32a   :  { %v413_v52 = vsub.f32 0.0, %v410_v50 }
 0x32c   :  { %v414_v53 = vmul.f32 1.442695, %v413_v52 }
 0x32e   :  { %488 = vpow2.f32 %v414_v53 }
 0x33b   :  { %v489_v54 = vpop.eup %488 }
 0x33c   :  { %v416_v55 = vadd.f32 1.0, %v489_v54 }
 0x33e   :  { %490 = vrcp.f32 %v416_v55 }
 0x34b   :  { %v491_v56 = vpop.eup %490 }
 0x34c   :  { %418 = vst [vmem:[%s629_s9] sm:$0x1] %v491_v56 }

</bundles_post_ra>
